<compile_context>
chip_gen: v7x
topology: tpu7x:2x2x1
jax: 0.10.0
libtpu: 0.0.40
codegen_flags: <defaults>
</compile_context>

<pallas_src>
import jax
import jax.numpy as jnp
from jax.experimental import pallas as pl
from jax.experimental.pallas import tpu as pltpu


# ---------------------------------------------------------------------------
# kernel
# ---------------------------------------------------------------------------
def autoencoder_kernel(x_ref,
                       w1_ref, b1_ref,
                       w2_ref, b2_ref,
                       w3_ref, b3_ref,
                       w4_ref, b4_ref,
                       enc_ref, dec_ref):
    """One batch-tile of the full autoencoder forward pass.

    Matmuls run on the MXU with bf16 inputs / f32 accumulation; the f32->bf16
    input cast, bias adds and ReLUs ride on the VPU (free VLIW slots next to
    the matmul chain).
    """
    x = x_ref[...].astype(jnp.bfloat16)                                # (bt, D_in)

    # ---- encoder ----
    h1 = jnp.dot(x, w1_ref[...], preferred_element_type=jnp.float32) + b1_ref[...]
    h1 = jnp.maximum(h1, 0.0).astype(jnp.bfloat16)                     # ReLU
    enc = jnp.dot(h1, w2_ref[...], preferred_element_type=jnp.float32) + b2_ref[...]

    # ---- decoder ----
    h2 = jnp.dot(enc.astype(jnp.bfloat16), w3_ref[...],
                 preferred_element_type=jnp.float32) + b3_ref[...]
    h2 = jnp.maximum(h2, 0.0).astype(jnp.bfloat16)                     # ReLU
    dec = jnp.dot(h2, w4_ref[...], preferred_element_type=jnp.float32) + b4_ref[...]

    enc_ref[...] = enc.astype(enc_ref.dtype)                           # bf16 writeback
    dec_ref[...] = dec.astype(dec_ref.dtype)                           # bf16 writeback


# ---------------------------------------------------------------------------
# wrapper
# ---------------------------------------------------------------------------
_LANE = 128       # lane width: weight/output feature dims padded to multiples of this
_MAX_TILE = 1024  # rows per grid step for large batches (amortizes ~0.35 us/step)
_SPLIT_MIN = 512  # at/above this batch, split into >=2 steps so v7x's 2 TCs both run


def _round_up(n, m):
    return ((n + m - 1) // m) * m


def _pad2(a, rows, cols, dtype):
    a = a.astype(dtype)
    return jnp.pad(a, ((0, rows - a.shape[0]), (0, cols - a.shape[1])))


def _autoencoder_forward(x, params):
    """x: (B, D_in) float32. params: dict of pre-transposed weights / biases.

    Returns (encoded (B, C) bf16, decoded (B, D_in) bf16).
    """
    B, D_in = x.shape
    H = params["w1"].shape[1]
    C = params["w2"].shape[1]

    # padded (lane-dense) feature dims for weights / outputs
    H_p = _round_up(H, _LANE)
    C_p = _round_up(C, _LANE)
    D_out_p = _round_up(D_in, _LANE)

    # ---- batch tile selection ----
    if B > _MAX_TILE:
        bt = _MAX_TILE                          # big streaming tiles, >=2 steps
    elif B >= _SPLIT_MIN:
        bt = _round_up(pl.cdiv(B, 2), 16)       # 2 steps -> both v7x TensorCores busy
    else:
        bt = B                                  # one full-extent step (no pipelining)
    grid = (pl.cdiv(B, bt),)                    # partial last block handled by Pallas

    # ---- one-time, tiny weight/bias padding (zero padding keeps math exact) ----
    w1_p = _pad2(params["w1"], D_in, H_p, jnp.bfloat16)   # x stays unpadded on K
    w2_p = _pad2(params["w2"], H_p, C_p, jnp.bfloat16)
    w3_p = _pad2(params["w3"], C_p, H_p, jnp.bfloat16)
    w4_p = _pad2(params["w4"], H_p, D_out_p, jnp.bfloat16)
    b1_p = _pad2(params["b1"], 1, H_p, jnp.float32)
    b2_p = _pad2(params["b2"], 1, C_p, jnp.float32)
    b3_p = _pad2(params["b3"], 1, H_p, jnp.float32)
    b4_p = _pad2(params["b4"], 1, D_out_p, jnp.float32)

    # Grid-invariant operands: constant index_map -> fetched once, VMEM-resident.
    # (If H/C ever grow large, add pipeline_mode=pl.Buffered(1) here to single-buffer.)
    resident = lambda shape: pl.BlockSpec(shape, lambda i: (0, 0))

    enc_p, dec_p = pl.pallas_call(
        autoencoder_kernel,
        out_shape=(
            jax.ShapeDtypeStruct((B, C_p), jnp.bfloat16),
            jax.ShapeDtypeStruct((B, D_out_p), jnp.bfloat16),
        ),
        grid_spec=pltpu.PrefetchScalarGridSpec(
            num_scalar_prefetch=0,
            grid=grid,
            in_specs=[
                pl.BlockSpec((bt, D_in), lambda i: (i, 0)),     # x tile streams (f32, true extent)
                resident((D_in, H_p)),    resident((1, H_p)),   # w1, b1
                resident((H_p, C_p)),     resident((1, C_p)),   # w2, b2
                resident((C_p, H_p)),     resident((1, H_p)),   # w3, b3
                resident((H_p, D_out_p)), resident((1, D_out_p)),  # w4, b4
            ],
            out_specs=[
                pl.BlockSpec((bt, C_p), lambda i: (i, 0)),      # encoded tile (lane-dense)
                pl.BlockSpec((bt, D_out_p), lambda i: (i, 0)),  # decoded tile (lane-dense)
            ],
        ),
        compiler_params=pltpu.CompilerParams(
            dimension_semantics=("parallel",),
            vmem_limit_bytes=32 * 1024 * 1024,
        ),
    )(x, w1_p, b1_p, w2_p, b2_p, w3_p, b3_p, w4_p, b4_p)

    # slice off lane padding (fused under jit; padded columns are exactly zero)
    return enc_p[:, :C], dec_p[:, :D_in]


# jit so the weight pads and the output slices fuse instead of eager HBM round trips
autoencoder_forward = jax.jit(_autoencoder_forward)


# ---------------------------------------------------------------------------
# params / references
# ---------------------------------------------------------------------------
def init_params(key, input_dim, hidden_dim, code_dim):
    """Deterministic parameter init (PyTorch nn.Linear-style uniform bounds)."""
    keys = jax.random.split(key, 8)

    def linear(kw, kb, fan_in, fan_out):
        bound = 1.0 / jnp.sqrt(fan_in)
        # stored as (in, out): equivalent to PyTorch weight.T
        w = jax.random.uniform(kw, (fan_in, fan_out), jnp.float32, -bound, bound)
        b = jax.random.uniform(kb, (1, fan_out), jnp.float32, -bound, bound)
        return w, b

    w1, b1 = linear(keys[0], keys[1], input_dim, hidden_dim)
    w2, b2 = linear(keys[2], keys[3], hidden_dim, code_dim)
    w3, b3 = linear(keys[4], keys[5], code_dim, hidden_dim)
    w4, b4 = linear(keys[6], keys[7], hidden_dim, input_dim)
    return dict(w1=w1, b1=b1, w2=w2, b2=b2, w3=w3, b3=b3, w4=w4, b4=b4)


def reference_forward_f32(x, p):
    """Plain-JAX f32 reference mirroring the PyTorch forward."""
    h1 = jnp.maximum(x @ p["w1"] + p["b1"], 0.0)
    enc = h1 @ p["w2"] + p["b2"]
    h2 = jnp.maximum(enc @ p["w3"] + p["b3"], 0.0)
    dec = h2 @ p["w4"] + p["b4"]
    return enc, dec


def reference_forward_bf16(x, p):
    """Plain-JAX reference with the same bf16-in / f32-accumulate scheme as the kernel."""
    bf = jnp.bfloat16
    h1 = jnp.dot(x.astype(bf), p["w1"].astype(bf),
                 preferred_element_type=jnp.float32) + p["b1"]
    h1 = jnp.maximum(h1, 0.0)
    enc = jnp.dot(h1.astype(bf), p["w2"].astype(bf),
                  preferred_element_type=jnp.float32) + p["b2"]
    h2 = jnp.dot(enc.astype(bf), p["w3"].astype(bf),
                 preferred_element_type=jnp.float32) + p["b3"]
    h2 = jnp.maximum(h2, 0.0)
    dec = jnp.dot(h2.astype(bf), p["w4"].astype(bf),
                  preferred_element_type=jnp.float32) + p["b4"]
    return enc, dec


# ---------------------------------------------------------------------------
# demo / self-check
# ---------------------------------------------------------------------------
if __name__ == "__main__":
    # Small shapes consistent with the module (code_dim=54, hidden_dim=128).
    batch = 16
    input_dim = 64
    hidden_dim = 128
    code_dim = 54

    key = jax.random.PRNGKey(0)
    kx, kp, kx2 = jax.random.split(key, 3)
    x = jax.random.normal(kx, (batch, input_dim), jnp.float32)
    params = init_params(kp, input_dim, hidden_dim, code_dim)

    enc, dec = autoencoder_forward(x, params)
    jax.block_until_ready((enc, dec))

    assert enc.shape == (batch, code_dim) and enc.dtype == jnp.bfloat16
    assert dec.shape == (batch, input_dim) and dec.dtype == jnp.bfloat16

    enc32 = enc.astype(jnp.float32)
    dec32 = dec.astype(jnp.float32)

    # tight check vs a reference using the same bf16/f32-accumulate arithmetic
    enc_b, dec_b = reference_forward_bf16(x, params)
    assert jnp.allclose(enc32, enc_b, atol=2e-2, rtol=2e-2)
    assert jnp.allclose(dec32, dec_b, atol=2e-2, rtol=2e-2)

    # loose check vs the pure-f32 PyTorch-equivalent reference (bf16 rounding only)
    enc_f, dec_f = reference_forward_f32(x, params)
    assert jnp.allclose(enc32, enc_f, atol=5e-2, rtol=5e-2)
    assert jnp.allclose(dec32, dec_f, atol=5e-2, rtol=5e-2)

    # exercise the multi-step grid path (2 parallel tiles, partial last block)
    B2 = 530
    x2 = jax.random.normal(kx2, (B2, input_dim), jnp.float32)
    enc2, dec2 = autoencoder_forward(x2, params)
    jax.block_until_ready((enc2, dec2))
    enc2_b, dec2_b = reference_forward_bf16(x2, params)
    assert enc2.shape == (B2, code_dim) and dec2.shape == (B2, input_dim)
    assert jnp.allclose(enc2.astype(jnp.float32), enc2_b, atol=2e-2, rtol=2e-2)
    assert jnp.allclose(dec2.astype(jnp.float32), dec2_b, atol=2e-2, rtol=2e-2)

    print("KERNEL_OK")
</pallas_src>

<mosaic_0001>
module attributes {stable_mosaic.version = 11 : i64} {
  func.func @autoencoder_kernel(%arg0: i32, %arg1: memref<16x64xf32, #tpu.memory_space<vmem>>, %arg2: memref<64x128xbf16, #tpu.memory_space<vmem>>, %arg3: memref<1x128xf32, #tpu.memory_space<vmem>>, %arg4: memref<128x128xbf16, #tpu.memory_space<vmem>>, %arg5: memref<1x128xf32, #tpu.memory_space<vmem>>, %arg6: memref<128x128xbf16, #tpu.memory_space<vmem>>, %arg7: memref<1x128xf32, #tpu.memory_space<vmem>>, %arg8: memref<128x128xbf16, #tpu.memory_space<vmem>>, %arg9: memref<1x128xf32, #tpu.memory_space<vmem>>, %arg10: memref<16x128xbf16, #tpu.memory_space<vmem>>, %arg11: memref<16x128xbf16, #tpu.memory_space<vmem>>) attributes {dimension_semantics = [#tpu.dimension_semantics<parallel>], iteration_bounds = array<i64: 1>, scalar_prefetch = 0 : i64, scratch_operands = 0 : i64, tpu.core_type = #tpu.core_type<tc>, window_params = [{transform_indices = @transform_0, window_bounds = array<i64: 16, 64>}, {pipeline_mode = #tpu.pipeline_mode<synchronous>, transform_indices = @transform_1, window_bounds = array<i64: 64, 128>}, {pipeline_mode = #tpu.pipeline_mode<synchronous>, transform_indices = @transform_2, window_bounds = array<i64: 1, 128>}, {pipeline_mode = #tpu.pipeline_mode<synchronous>, transform_indices = @transform_3, window_bounds = array<i64: 128, 128>}, {pipeline_mode = #tpu.pipeline_mode<synchronous>, transform_indices = @transform_4, window_bounds = array<i64: 1, 128>}, {pipeline_mode = #tpu.pipeline_mode<synchronous>, transform_indices = @transform_5, window_bounds = array<i64: 128, 128>}, {pipeline_mode = #tpu.pipeline_mode<synchronous>, transform_indices = @transform_6, window_bounds = array<i64: 1, 128>}, {pipeline_mode = #tpu.pipeline_mode<synchronous>, transform_indices = @transform_7, window_bounds = array<i64: 128, 128>}, {pipeline_mode = #tpu.pipeline_mode<synchronous>, transform_indices = @transform_8, window_bounds = array<i64: 1, 128>}, {transform_indices = @transform_9, window_bounds = array<i64: 16, 128>}, {transform_indices = @transform_10, window_bounds = array<i64: 16, 128>}]} {
    %c0 = arith.constant 0 : index
    %c0_0 = arith.constant 0 : index
    %0 = vector.load %arg1[%c0, %c0_0] : memref<16x64xf32, #tpu.memory_space<vmem>>, vector<16x64xf32>
    %1 = arith.truncf %0 : vector<16x64xf32> to vector<16x64xbf16>
    %c0_1 = arith.constant 0 : index
    %c0_2 = arith.constant 0 : index
    %2 = vector.load %arg2[%c0_1, %c0_2] : memref<64x128xbf16, #tpu.memory_space<vmem>>, vector<64x128xbf16>
    %cst = arith.constant dense<0.000000e+00> : vector<16x128xf32>
    %3 = tpu.matmul %1, %2, %cst {dimension_numbers = #tpu.dot_dimension_numbers<[1], [0], [0], [1], [0, 0, 1, 1], [], []>} : vector<16x64xbf16>, vector<64x128xbf16>, vector<16x128xf32> -> vector<16x128xf32>
    %c0_3 = arith.constant 0 : index
    %c0_4 = arith.constant 0 : index
    %4 = vector.load %arg3[%c0_3, %c0_4] : memref<1x128xf32, #tpu.memory_space<vmem>>, vector<1x128xf32>
    %5 = vector.broadcast %4 : vector<1x128xf32> to vector<16x128xf32>
    %6 = arith.addf %3, %5 : vector<16x128xf32>
    %cst_5 = arith.constant 0.000000e+00 : f32
    %7 = vector.broadcast %cst_5 : f32 to vector<16x128xf32>
    %8 = arith.maximumf %6, %7 : vector<16x128xf32>
    %9 = arith.truncf %8 : vector<16x128xf32> to vector<16x128xbf16>
    %c0_6 = arith.constant 0 : index
    %c0_7 = arith.constant 0 : index
    %10 = vector.load %arg4[%c0_6, %c0_7] : memref<128x128xbf16, #tpu.memory_space<vmem>>, vector<128x128xbf16>
    %cst_8 = arith.constant dense<0.000000e+00> : vector<16x128xf32>
    %11 = tpu.matmul %9, %10, %cst_8 {dimension_numbers = #tpu.dot_dimension_numbers<[1], [0], [0], [1], [0, 0, 1, 1], [], []>} : vector<16x128xbf16>, vector<128x128xbf16>, vector<16x128xf32> -> vector<16x128xf32>
    %c0_9 = arith.constant 0 : index
    %c0_10 = arith.constant 0 : index
    %12 = vector.load %arg5[%c0_9, %c0_10] : memref<1x128xf32, #tpu.memory_space<vmem>>, vector<1x128xf32>
    %13 = vector.broadcast %12 : vector<1x128xf32> to vector<16x128xf32>
    %14 = arith.addf %11, %13 : vector<16x128xf32>
    %15 = arith.truncf %14 : vector<16x128xf32> to vector<16x128xbf16>
    %c0_11 = arith.constant 0 : index
    %c0_12 = arith.constant 0 : index
    %16 = vector.load %arg6[%c0_11, %c0_12] : memref<128x128xbf16, #tpu.memory_space<vmem>>, vector<128x128xbf16>
    %cst_13 = arith.constant dense<0.000000e+00> : vector<16x128xf32>
    %17 = tpu.matmul %15, %16, %cst_13 {dimension_numbers = #tpu.dot_dimension_numbers<[1], [0], [0], [1], [0, 0, 1, 1], [], []>} : vector<16x128xbf16>, vector<128x128xbf16>, vector<16x128xf32> -> vector<16x128xf32>
    %c0_14 = arith.constant 0 : index
    %c0_15 = arith.constant 0 : index
    %18 = vector.load %arg7[%c0_14, %c0_15] : memref<1x128xf32, #tpu.memory_space<vmem>>, vector<1x128xf32>
    %19 = vector.broadcast %18 : vector<1x128xf32> to vector<16x128xf32>
    %20 = arith.addf %17, %19 : vector<16x128xf32>
    %cst_16 = arith.constant 0.000000e+00 : f32
    %21 = vector.broadcast %cst_16 : f32 to vector<16x128xf32>
    %22 = arith.maximumf %20, %21 : vector<16x128xf32>
    %23 = arith.truncf %22 : vector<16x128xf32> to vector<16x128xbf16>
    %c0_17 = arith.constant 0 : index
    %c0_18 = arith.constant 0 : index
    %24 = vector.load %arg8[%c0_17, %c0_18] : memref<128x128xbf16, #tpu.memory_space<vmem>>, vector<128x128xbf16>
    %cst_19 = arith.constant dense<0.000000e+00> : vector<16x128xf32>
    %25 = tpu.matmul %23, %24, %cst_19 {dimension_numbers = #tpu.dot_dimension_numbers<[1], [0], [0], [1], [0, 0, 1, 1], [], []>} : vector<16x128xbf16>, vector<128x128xbf16>, vector<16x128xf32> -> vector<16x128xf32>
    %c0_20 = arith.constant 0 : index
    %c0_21 = arith.constant 0 : index
    %26 = vector.load %arg9[%c0_20, %c0_21] : memref<1x128xf32, #tpu.memory_space<vmem>>, vector<1x128xf32>
    %27 = vector.broadcast %26 : vector<1x128xf32> to vector<16x128xf32>
    %28 = arith.addf %25, %27 : vector<16x128xf32>
    %29 = arith.truncf %14 : vector<16x128xf32> to vector<16x128xbf16>
    %c0_22 = arith.constant 0 : index
    %c0_23 = arith.constant 0 : index
    %30 = vector.load %arg10[%c0_22, %c0_23] : memref<16x128xbf16, #tpu.memory_space<vmem>>, vector<16x128xbf16>
    tpu.vector_store %arg10[%c0_22, %c0_23], %29 {strides = array<i32>} : memref<16x128xbf16, #tpu.memory_space<vmem>>, vector<16x128xbf16>,
    %31 = arith.truncf %28 : vector<16x128xf32> to vector<16x128xbf16>
    %c0_24 = arith.constant 0 : index
    %c0_25 = arith.constant 0 : index
    %32 = vector.load %arg11[%c0_24, %c0_25] : memref<16x128xbf16, #tpu.memory_space<vmem>>, vector<16x128xbf16>
    tpu.vector_store %arg11[%c0_24, %c0_25], %31 {strides = array<i32>} : memref<16x128xbf16, #tpu.memory_space<vmem>>, vector<16x128xbf16>,
    return
  }
  func.func @transform_0(%arg0: i32) -> (i32, i32) {
    %c0_i32 = arith.constant 0 : i32
    %c0_i32_0 = arith.constant 0 : i32
    return %arg0, %c0_i32 : i32, i32
  }
  func.func @transform_1(%arg0: i32) -> (i32, i32) {
    %c0_i32 = arith.constant 0 : i32
    %c0_i32_0 = arith.constant 0 : i32
    %c0_i32_1 = arith.constant 0 : i32
    return %c0_i32, %c0_i32_0 : i32, i32
  }
  func.func @transform_2(%arg0: i32) -> (i32, i32) {
    %c0_i32 = arith.constant 0 : i32
    %c0_i32_0 = arith.constant 0 : i32
    %c0_i32_1 = arith.constant 0 : i32
    return %c0_i32, %c0_i32_0 : i32, i32
  }
  func.func @transform_3(%arg0: i32) -> (i32, i32) {
    %c0_i32 = arith.constant 0 : i32
    %c0_i32_0 = arith.constant 0 : i32
    %c0_i32_1 = arith.constant 0 : i32
    return %c0_i32, %c0_i32_0 : i32, i32
  }
  func.func @transform_4(%arg0: i32) -> (i32, i32) {
    %c0_i32 = arith.constant 0 : i32
    %c0_i32_0 = arith.constant 0 : i32
    %c0_i32_1 = arith.constant 0 : i32
    return %c0_i32, %c0_i32_0 : i32, i32
  }
  func.func @transform_5(%arg0: i32) -> (i32, i32) {
    %c0_i32 = arith.constant 0 : i32
    %c0_i32_0 = arith.constant 0 : i32
    %c0_i32_1 = arith.constant 0 : i32
    return %c0_i32, %c0_i32_0 : i32, i32
  }
  func.func @transform_6(%arg0: i32) -> (i32, i32) {
    %c0_i32 = arith.constant 0 : i32
    %c0_i32_0 = arith.constant 0 : i32
    %c0_i32_1 = arith.constant 0 : i32
    return %c0_i32, %c0_i32_0 : i32, i32
  }
  func.func @transform_7(%arg0: i32) -> (i32, i32) {
    %c0_i32 = arith.constant 0 : i32
    %c0_i32_0 = arith.constant 0 : i32
    %c0_i32_1 = arith.constant 0 : i32
    return %c0_i32, %c0_i32_0 : i32, i32
  }
  func.func @transform_8(%arg0: i32) -> (i32, i32) {
    %c0_i32 = arith.constant 0 : i32
    %c0_i32_0 = arith.constant 0 : i32
    %c0_i32_1 = arith.constant 0 : i32
    return %c0_i32, %c0_i32_0 : i32, i32
  }
  func.func @transform_9(%arg0: i32) -> (i32, i32) {
    %c0_i32 = arith.constant 0 : i32
    %c0_i32_0 = arith.constant 0 : i32
    return %arg0, %c0_i32 : i32, i32
  }
  func.func @transform_10(%arg0: i32) -> (i32, i32) {
    %c0_i32 = arith.constant 0 : i32
    %c0_i32_0 = arith.constant 0 : i32
    return %arg0, %c0_i32 : i32, i32
  }
}

</mosaic_0001>

<bundles_post_ra>
// kernel: _autoencoder_forward.1
= control target key start
LH: loop header
LB: loop body
LE: loop exit
PB: predicated region body
PF: predicated region fallthrough
CT: control target
= control target key end

     0   :  { %16 = vsyncpa [#allocation3], 0  ;;  %v755_v1 = vmov 0.0   ;;  %vm756_vm0 = vmmov 0   ;;  %vm79_vm1 = vcmask 523264   ;;  %s984_s0 = inlined_call_operand.vmem [shape: f32[16,64], index: 0, kind: input, shape index: {}]   ;;  %s985_s1 = inlined_call_operand.vmem [shape: bf16[64,128], index: 1, kind: input, shape index: {}]   ;;  %s986_s2 = inlined_call_operand.vmem [shape: f32[1,128], index: 2, kind: input, shape index: {}]   ;;  %s987_s3 = inlined_call_operand.vmem [shape: bf16[128,128], index: 3, kind: input, shape index: {}]   ;;  %s988_s4 = inlined_call_operand.vmem [shape: f32[1,128], index: 4, kind: input, shape index: {}]   ;;  %s989_s5 = inlined_call_operand.vmem [shape: bf16[128,128], index: 5, kind: input, shape index: {}]   ;;  %s990_s6 = inlined_call_operand.vmem [shape: f32[1,128], index: 6, kind: input, shape index: {}]   ;;  %s991_s7 = inlined_call_operand.vmem [shape: bf16[128,128], index: 7, kind: input, shape index: {}]   ;;  %s992_s8 = inlined_call_operand.vmem [shape: f32[1,128], index: 8, kind: input, shape index: {}]   ;;  %s993_s9 = inlined_call_operand.hbm [shape: bf16[16,128], index: 9, kind: output, shape index: {0}]   ;;  %s994_s10 = inlined_call_operand.hbm [shape: bf16[16,128], index: 10, kind: output, shape index: {1}]  }
   0x1   :  { %v679_v0 = vld [vmem:[%s985_s1] sm:$0xff]   ;;  %601 = vmatprep.subr.bf16.mxu0 %v755_v1  ;;  %613 = vmatprep.subr.bf16.mxu1 %v755_v1  ;;  %v680_v2 = vld [vmem:[%s985_s1 + $0x8] sm:$0xff]   ;;  %v681_v4 = vld [vmem:[%s985_s1 + $0x10] sm:$0xff]  }
   0x2   :  { %602 = vmatpush3.bf16.msra.mxu0 %v679_v0  ;;  %609 = vmatprep.mubr.msk.bf16.mxu0 %vm756_vm0, %v755_v1  ;;  %v683_v3 = vld [vmem:[%s987_s3] sm:$0xff]   ;;  %v684_v5 = vld [vmem:[%s987_s3 + $0x8] sm:$0xff]   ;;  %v682_v6 = vld [vmem:[%s985_s1 + $0x18] sm:$0xff]  }
   0x3   :  { %603 = vmatprep.subr.bf16.mxu0 %v755_v1  ;;  %629 = vmatprep.mubr.msk.bf16.mxu1 %vm756_vm0, %v755_v1  ;;  %v37_v7 = vld [vmem:[%s984_s0] sm:$0xff]  ;;  %v38_v8 = vld [vmem:[%s984_s0 + $0x8] sm:$0xff]  ;;  %v685_v9 = vld [vmem:[%s987_s3 + $0x10] sm:$0xff]  }
   0x4   :  { %614 = vmatpush3.bf16.msra.mxu1 %v683_v3  ;;  %v39_v10 = vpack.c.bf16 %v38_v8, %v37_v7  ;;  %v686_v11 = vld [vmem:[%s987_s3 + $0x18] sm:$0xff]   ;;  %v687_v12 = vld [vmem:[%s987_s3 + $0x20] sm:$0xff]   ;;  %v688_v13 = vld [vmem:[%s987_s3 + $0x28] sm:$0xff]  }
   0x5   :  { %615 = vmatprep.subr.bf16.mxu1 %v755_v1 }
   0x6   :  { %604 = vmatpush3.bf16.msra.mxu0 %v680_v2 }
   0x7   :  { %605 = vmatprep.subr.bf16.mxu0 %v755_v1 }
   0x8   :  { %616 = vmatpush3.bf16.msra.mxu1 %v684_v5 }
   0x9   :  { %617 = vmatprep.subr.bf16.mxu1 %v755_v1 }
   0xa   :  { %606 = vmatpush3.bf16.msra.mxu0 %v681_v4 }
   0xb   :  { %607 = vmatprep.subr.bf16.mxu0 %v755_v1 }
   0xc   :  { %618 = vmatpush3.bf16.msra.mxu1 %v685_v9 }
   0xd   :  { %619 = vmatprep.subr.bf16.mxu1 %v755_v1 }
   0xe   :  { %608 = vmatpush3.bf16.msra.mxu0 %v682_v6 }
   0xf   :  { %633 = vmatprep.subr.bf16.mxu0 %v755_v1 }
  0x10   :  { %620 = vmatpush3.bf16.msra.mxu1 %v686_v11 }
  0x11   :  { %610 = vmatmul.mubr.msk.bf16.vlgmr.msra.gmra.mrb[0].mxu0 %vm79_vm1, %v39_v10  ;;  %621 = vmatprep.subr.bf16.mxu1 %v755_v1 }
  0x12   :  { %649 = vmatprep.mubr.msk.bf16.mxu0 %vm756_vm0, %v755_v1 }
  0x14   :  { %622 = vmatpush3.bf16.msra.mxu1 %v687_v12 }
  0x15   :  { %17 = vsyncpa [#allocation5], 0  ;;  %623 = vmatprep.subr.bf16.mxu1 %v755_v1  ;;  %v689_v14 = vld [vmem:[%s987_s3 + $0x30] sm:$0xff]   ;;  %v690_v15 = vld [vmem:[%s987_s3 + $0x38] sm:$0xff]   ;;  %s757_s30 = smov [#allocation2]  }
  0x16   :  { %v691_v16 = vld [vmem:[%s989_s5] sm:$0xff]   ;;  %v692_v17 = vld [vmem:[%s989_s5 + $0x8] sm:$0xff]   ;;  %v693_v18 = vld [vmem:[%s989_s5 + $0x10] sm:$0xff]   ;;  %s491_s1 = sshll.u32 %s757_s30, 4  ;;  %s492_s1 = int_to_ptr.vmem [resolvable:$true] %s491_s1 }
  0x17   :  { %634 = vmatpush3.bf16.msra.mxu0 %v691_v16  ;;  %v694_v19 = vld [vmem:[%s989_s5 + $0x18] sm:$0xff]   ;;  %v695_v20 = vld [vmem:[%s989_s5 + $0x20] sm:$0xff]   ;;  %v696_v21 = vld [vmem:[%s989_s5 + $0x28] sm:$0xff]   ;;  %s707_s11 = scalar_lea.vmem %s492_s1, 128  ;;  %p712_p1 = scmp.lt.s32.totalorder %s492_s1, %s492_s1 }
  0x18   :  { %624 = vmatpush3.bf16.msra.mxu1 %v688_v13  ;;  %635 = vmatprep.subr.bf16.mxu0 %v755_v1  ;;  %v518_v22 = vld [vmem:[%s986_s2] ss:$0 sm:$0xff]  ;;  %v697_v32 = vld [vmem:[%s989_s5 + $0x30] sm:$0xff]   ;;  %v698_v33 = vld [vmem:[%s989_s5 + $0x38] sm:$0xff]   ;;  %p708_p0 = scmp.ne.s32.totalorder %s492_s1, %s707_s11  ;;  %p713_p2 = scmp.lt.s32.totalorder %s707_s11, %s707_s11 }
  0x19   :  { %625 = vmatprep.subr.bf16.mxu1 %v755_v1  ;;  %v699_v34 = vld [vmem:[%s991_s7] sm:$0xff]   ;;  %v700_v35 = vld [vmem:[%s991_s7 + $0x8] sm:$0xff]   ;;  %v701_v36 = vld [vmem:[%s991_s7 + $0x10] sm:$0xff]  }
  0x1a   :  { %v702_v37 = vld [vmem:[%s991_s7 + $0x18] sm:$0xff]   ;;  %v703_v38 = vld [vmem:[%s991_s7 + $0x20] sm:$0xff]   ;;  %v704_v39 = vld [vmem:[%s991_s7 + $0x28] sm:$0xff]   ;;  %p714_p3 = por %p713_p2, %p712_p1 }
  0x1b   :  { %636 = vmatpush3.bf16.msra.mxu0 %v692_v17  ;;  %v524_v40 = vld [vmem:[%s988_s4] ss:$0 sm:$0xff]  ;;  %v705_v48 = vld [vmem:[%s991_s7 + $0x30] sm:$0xff]   ;;  %v706_v49 = vld [vmem:[%s991_s7 + $0x38] sm:$0xff]  }
  0x1c   :  { %626 = vmatpush3.bf16.msra.mxu1 %v689_v14  ;;  %637 = vmatprep.subr.bf16.mxu0 %v755_v1  ;;  %v533_v50 = vld [vmem:[%s990_s6] ss:$0 sm:$0xff]  ;;  %p715_p4 = pnand %p714_p3, %p708_p0 }
  0x1d   :  { %627 = vmatprep.subr.bf16.mxu1 %v755_v1 }
  0x1f   :  { %638 = vmatpush3.bf16.msra.mxu0 %v693_v18 }
  0x20   :  { %628 = vmatpush3.bf16.msra.mxu1 %v690_v15  ;;  %639 = vmatprep.subr.bf16.mxu0 %v755_v1 }
  0x21   :  { %653 = vmatprep.subr.bf16.mxu1 %v755_v1 }
  0x23   :  { %640 = vmatpush3.bf16.msra.mxu0 %v694_v19 }
  0x24   :  { %641 = vmatprep.subr.bf16.mxu0 %v755_v1 }
  0x27   :  { %642 = vmatpush3.bf16.msra.mxu0 %v695_v20 }
  0x28   :  { %643 = vmatprep.subr.bf16.mxu0 %v755_v1 }
  0x2b   :  { %644 = vmatpush3.bf16.msra.mxu0 %v696_v21 }
  0x2c   :  { %645 = vmatprep.subr.bf16.mxu0 %v755_v1 }
  0x2f   :  { %646 = vmatpush3.bf16.msra.mxu0 %v697_v32 }
  0x30   :  { %647 = vmatprep.subr.bf16.mxu0 %v755_v1 }
  0x33   :  { %648 = vmatpush3.bf16.msra.mxu0 %v698_v33 }
  0xe4   :  { %v117_v23 = vpop.f32.mrb[0].mxu0 }
  0xe5   :  { %v118_v24 = vadd.f32 %v518_v22, %v117_v23  ;;  %v611_v25 = vpop.f32.mrb[1].mxu0 }
  0xe6   :  { %v120_v26 = vpop.f32.mrb[2].mxu0 }
  0xe7   :  { %v121_v27 = vadd.f32 %v518_v22, %v120_v26  ;;  %v612_v28 = vpop.f32.mrb[3].mxu0  ;;  %v124_v29 = vmax.f32 %v118_v24, 0.0 }
  0xe9   :  { %v125_v30 = vmax.f32 %v121_v27, 0.0 }
  0xeb   :  { %v126_v31 = vpack.c.bf16 %v125_v30, %v124_v29 }
  0xed   :  { %630 = vmatmul.mubr.bf16.vlgmr.msra.gmra.mrb[0].mxu1 %v126_v31 }
  0xee   :  { %669 = vmatprep.mubr.msk.bf16.mxu1 %vm756_vm0, %v755_v1  ;;  %654 = vmatpush3.bf16.msra.mxu1 %v699_v34 }
  0xef   :  { %655 = vmatprep.subr.bf16.mxu1 %v755_v1 }
  0xf2   :  { %656 = vmatpush3.bf16.msra.mxu1 %v700_v35 }
  0xf3   :  { %657 = vmatprep.subr.bf16.mxu1 %v755_v1 }
  0xf6   :  { %658 = vmatpush3.bf16.msra.mxu1 %v701_v36 }
  0xf7   :  { %659 = vmatprep.subr.bf16.mxu1 %v755_v1 }
  0xfa   :  { %660 = vmatpush3.bf16.msra.mxu1 %v702_v37 }
  0xfb   :  { %661 = vmatprep.subr.bf16.mxu1 %v755_v1 }
  0xfe   :  { %662 = vmatpush3.bf16.msra.mxu1 %v703_v38 }
  0xff   :  { %663 = vmatprep.subr.bf16.mxu1 %v755_v1 }
 0x102   :  { %664 = vmatpush3.bf16.msra.mxu1 %v704_v39 }
 0x103   :  { %665 = vmatprep.subr.bf16.mxu1 %v755_v1 }
 0x106   :  { %666 = vmatpush3.bf16.msra.mxu1 %v705_v48 }
 0x107   :  { %667 = vmatprep.subr.bf16.mxu1 %v755_v1 }
 0x10a   :  { %668 = vmatpush3.bf16.msra.mxu1 %v706_v49 }
 0x1c0   :  { %v232_v41 = vpop.f32.mrb[0].mxu1 }
 0x1c1   :  { %v631_v42 = vpop.f32.mrb[1].mxu1  ;;  %v233_v44 = vadd.f32 %v524_v40, %v232_v41 }
 0x1c2   :  { %v235_v43 = vpop.f32.mrb[2].mxu1 }
 0x1c3   :  { %v236_v45 = vadd.f32 %v524_v40, %v235_v43  ;;  %v632_v46 = vpop.f32.mrb[3].mxu1 }
 0x1c5   :  { %v239_v47 = vpack.c.bf16 %v236_v45, %v233_v44 }
 0x1c7   :  { %563 = vst [vmem:[#allocation2] sm:$0xff] %v239_v47   ;;  %650 = vmatmul.mubr.bf16.vlgmr.msra.gmra.mrb[4].mxu0 %v239_v47 }
 0x29a   :  { %v345_v51 = vpop.f32.mrb[4].mxu0 }
 0x29b   :  { %v346_v52 = vadd.f32 %v533_v50, %v345_v51  ;;  %v651_v53 = vpop.f32.mrb[5].mxu0 }
 0x29c   :  { %v348_v54 = vpop.f32.mrb[6].mxu0 }
 0x29d   :  { %v349_v55 = vadd.f32 %v533_v50, %v348_v54  ;;  %v652_v56 = vpop.f32.mrb[7].mxu0  ;;  %v352_v57 = vmax.f32 %v346_v52, 0.0 }
 0x29f   :  { %v353_v58 = vmax.f32 %v349_v55, 0.0 }
 0x2a1   :  { %v354_v59 = vpack.c.bf16 %v353_v58, %v352_v57 }
 0x2a3   :  { %670 = vmatmul.mubr.bf16.vlgmr.msra.gmra.mrb[4].mxu1 %v354_v59 }
 0x2a4   :  { %718 = shalt.err (!%p715_p4)
}
 0x2a5   :  { %s719_s0 = scalar_lea.hbm %s993_s9, 128 }
 0x2a6   :  { %p720_p5 = scmp.ne.s32.totalorder %s993_s9, %s719_s0  ;;  %p723_p6 = scmp.lt.u32.totalorder %s719_s0, %s993_s9 }
 0x2a8   :  { %p725_p7 = pnand %p723_p6, %p720_p5 }
 0x2aa   :  { %728 = shalt.err (!%p725_p7)
}
 0x2ab   :  { %s758_s15 = smov 64   ;;  %s759_s16 = smov 4   ;;  %v542_v60 = vld [vmem:[%s992_s8] ss:$0 sm:$0xff] }
 0x2ac   :  { %497 = dma.vmem_to_hbm [thread:$0]  %s492_s1, 128, %s993_s9, [#allocation3], %s758_s15, %s758_s15, %s759_s16  }
 0x2ad   :  { %s760_s20 = smov [#allocation4]  }
 0x2ae   :  { %s503_s21 = sshll.u32 %s760_s20, 4  ;;  %s504_s21 = int_to_ptr.vmem [resolvable:$true] %s503_s21 }
 0x2af   :  { %s729_s22 = scalar_lea.vmem %s504_s21, 128  ;;  %p734_p9 = scmp.lt.s32.totalorder %s504_s21, %s504_s21 }
 0x2b0   :  { %p730_p8 = scmp.ne.s32.totalorder %s504_s21, %s729_s22  ;;  %p735_p10 = scmp.lt.s32.totalorder %s729_s22, %s729_s22 }
 0x2b2   :  { %p736_p11 = por %p735_p10, %p734_p9 }
 0x2b4   :  { %p737_p12 = pnand %p736_p11, %p730_p8 }
 0x376   :  { %v460_v61 = vpop.f32.mrb[4].mxu1 }
 0x377   :  { %v671_v62 = vpop.f32.mrb[5].mxu1  ;;  %v461_v0 = vadd.f32 %v542_v60, %v460_v61 }
 0x378   :  { %v463_v63 = vpop.f32.mrb[6].mxu1 }
 0x379   :  { %v464_v1 = vadd.f32 %v542_v60, %v463_v63  ;;  %v672_v2 = vpop.f32.mrb[7].mxu1 }
 0x37b   :  { %v567_v3 = vpack.c.bf16 %v464_v1, %v461_v0 }
 0x37d   :  { %568 = vst [vmem:[#allocation4] sm:$0xff] %v567_v3  }
 0x37e   :  { %740 = shalt.err (!%p737_p12)
}
 0x37f   :  { %s741_s23 = scalar_lea.hbm %s994_s10, 128 }
 0x380   :  { %p742_p13 = scmp.ne.s32.totalorder %s994_s10, %s741_s23  ;;  %p745_p0 = scmp.lt.u32.totalorder %s741_s23, %s994_s10 }
 0x382   :  { %p747_p1 = pnand %p745_p0, %p742_p13 }
 0x384   :  { %750 = shalt.err (!%p747_p1)
}
 0x385   :  { %509 = dma.vmem_to_hbm [thread:$0]  %s504_s21, 128, %s994_s10, [#allocation5], %s758_s15, %s758_s15, %s759_s16  }
 0x386   :  { %751 = dma.done.wait [#allocation3], 128  }
 0x387   :  { %752 = vsyncadd [#allocation3], 4294967168 }
 0x388   :  { %753 = dma.done.wait [#allocation5], 128  }
 0x389   :  { %754 = vsyncadd [#allocation5], 4294967168 }
 0x38a   :  { %516 = vsyncpa [#allocation3], 1 }
 0x38b   :  { %517 = vsyncpa [#allocation5], 1 }

</bundles_post_ra>
